<compile_context>
chip_gen: v7x
topology: tpu7x:2x2x1
jax: 0.10.0
libtpu: 0.0.40
codegen_flags: <defaults>
</compile_context>

<pallas_src>
import functools

import jax
import jax.numpy as jnp
from jax import lax
from jax.experimental import pallas as pl
from jax.experimental.pallas import tpu as pltpu


# ---------------------------------------------------------------------------
# Kernel 1: graph LayerNorm + ent_fc projection  (tiled over node rows)
# ---------------------------------------------------------------------------
def ent_proj_kernel(x_ref, g_ref, b_ref, w_ref, ln_ref, feat_ref):
    x = x_ref[...]                                            # [Tn, F]
    mu = jnp.mean(x, axis=-1, keepdims=True)
    xc = x - mu
    var = jnp.mean(xc * xc, axis=-1, keepdims=True)
    ln = xc * lax.rsqrt(var + 1e-5) * g_ref[...] + b_ref[...]
    ln_ref[...] = ln
    feat_ref[...] = jnp.dot(ln, w_ref[...], preferred_element_type=jnp.float32)  # [Tn, HD]


# ---------------------------------------------------------------------------
# Kernel 2: rel_fc projection + per-head relation attention score  (tiny)
# ---------------------------------------------------------------------------
def rel_proj_kernel(rel_ref, w_ref, ar_ref, selT_ref, er_ref):
    fr = jnp.dot(rel_ref[...], w_ref[...], preferred_element_type=jnp.float32)   # [R, HD]
    # er[r, h] = sum_d fr[r, h*D + d] * attn_r[h*D + d]
    er_ref[...] = lax.dot_general(fr * ar_ref[...], selT_ref[...],
                                  (((1,), (1,)), ((), ())),
                                  preferred_element_type=jnp.float32)            # [R, H]


# ---------------------------------------------------------------------------
# Kernel 3: edge scores -> LeakyReLU -> edge_softmax (per dst) -> PPR diffusion
#           (whole graph per invocation; heads looped in-kernel)
# ---------------------------------------------------------------------------
def attn_ppr_kernel(feat_ref, adj_ref, etype_ref, ah_ref, at_ref, selT_ref, er_ref,
                    out_ref, *, num_heads, head_dim, hop_num, alpha, slope):
    f32 = jnp.float32
    feat = feat_ref[...]                                      # [N, HD] f32 (lane-dense)
    adj = adj_ref[...]                                        # [N, N]  f32
    etype = etype_ref[...]                                    # [N, N]  int32
    mask = adj > 0.0
    selT = selT_ref[...]                                      # [H, HD] head selector
    ah = ah_ref[...]                                          # [1, HD]
    at = at_ref[...]                                          # [1, HD]

    # Per-head source / destination scores, computed in the orientation they are
    # consumed in (no HBM round trip, no transposes):
    #   eh_hn[h, s] = sum_d feat[s, h*D+d] * attn_h[h*D+d]   (row vector per head)
    #   et_nh[n, h] = sum_d feat[n, h*D+d] * attn_t[h*D+d]   (column per head)
    eh_hn = lax.dot_general(selT * ah, feat, (((1,), (1,)), ((), ())),
                            preferred_element_type=f32)       # [H, N]
    et_nh = lax.dot_general(feat, selT * at, (((1,), (1,)), ((), ())),
                            preferred_element_type=f32)       # [N, H]

    num_rel = er_ref.shape[0]
    head_outs = []
    for h in range(num_heads):
        # Relation score per edge, built from the tiny SMEM table er[R, H] + etype ids.
        rel = jnp.zeros_like(adj)
        for r in range(num_rel):
            rel = rel + jnp.where(etype == r, er_ref[r, h], 0.0)

        logits = et_nh[:, h:h + 1] + eh_hn[h:h + 1, :] + rel          # [Ndst, Nsrc]
        logits = jnp.where(logits >= 0.0, logits, slope * logits)     # LeakyReLU
        masked = jnp.where(mask, logits, jnp.float32(-1e30))
        mx = jnp.max(masked, axis=-1, keepdims=True)                  # max over incoming
        ex = jnp.where(mask, jnp.exp(masked - mx), 0.0)
        att = ex / jnp.sum(ex, axis=-1, keepdims=True)                # edge softmax [N, N]
        att_bf = att.astype(jnp.bfloat16)                             # bf16 MXU operand

        feat0 = feat[:, h * head_dim:(h + 1) * head_dim]              # [N, D] f32
        alpha_feat0 = alpha * feat0                                   # hoisted out of loop
        cur = feat0
        for _ in range(hop_num):                                      # PPR diffusion
            agg = jnp.dot(att_bf, cur.astype(jnp.bfloat16),
                          preferred_element_type=f32)                 # [N, D] f32 acc
            cur = (1.0 - alpha) * agg + alpha_feat0
        head_outs.append(cur)

    out_ref[...] = jnp.concatenate(head_outs, axis=-1)                # [N, HD] lane-dense


# ---------------------------------------------------------------------------
# Kernel 4: residual add + ff LayerNorm + position-wise FFN + residual add
#           (tiled over node rows, bf16 MXU operands / f32 accumulation)
# ---------------------------------------------------------------------------
def res_ffn_kernel(rst_ref, res_ref, g_ref, b_ref, w1_ref, b1_ref, w2_ref, b2_ref,
                   out_ref):
    rst = rst_ref[...] + res_ref[...]                                 # [Tn, HD]
    mu = jnp.mean(rst, axis=-1, keepdims=True)
    xc = rst - mu
    var = jnp.mean(xc * xc, axis=-1, keepdims=True)
    ln = xc * lax.rsqrt(var + 1e-5) * g_ref[...] + b_ref[...]
    h = jnp.maximum(
        jnp.dot(ln.astype(jnp.bfloat16), w1_ref[...],
                preferred_element_type=jnp.float32) + b1_ref[...], 0.0)
    ff = jnp.dot(h.astype(jnp.bfloat16), w2_ref[...],
                 preferred_element_type=jnp.float32) + b2_ref[...]
    out_ref[...] = ff + rst


# ---------------------------------------------------------------------------
# Wrapper: no gathers, no transposes — only BlockSpec plumbing and weight casts.
# ---------------------------------------------------------------------------
def rgdt_forward(params, ent_feat, rel_feat, adj, etype, *, num_heads, head_dim,
                 hop_num, alpha, slope):
    N, F_ent = ent_feat.shape
    R, F_rel = rel_feat.shape
    H, D = num_heads, head_dim
    HD = H * D
    f32 = jnp.float32

    # Identity residual path of the torch module requires in_ent_feats == out_ent_feats.
    assert F_ent == HD, "res_fc_ent is Identity only when in_ent_feats == out_ent_feats"

    row_tile = N if N <= 256 else 256
    assert N % row_tile == 0 and row_tile % 8 == 0 or row_tile == N
    n_row_blocks = N // row_tile

    selT = jnp.repeat(jnp.eye(H, dtype=f32), D, axis=1)               # [H, HD] head selector

    vmem_limit = 48 * 1024 * 1024
    cp_rows = pltpu.CompilerParams(dimension_semantics=("parallel",),
                                   vmem_limit_bytes=vmem_limit)
    cp_single = pltpu.CompilerParams(dimension_semantics=("arbitrary",),
                                     vmem_limit_bytes=vmem_limit)

    # --- kernel 1: LN + ent_fc, tiled over rows, weights resident ---
    ln, feat = pl.pallas_call(
        ent_proj_kernel,
        grid=(n_row_blocks,),
        in_specs=[pl.BlockSpec((row_tile, F_ent), lambda i: (i, 0)),
                  pl.BlockSpec((1, F_ent), lambda i: (0, 0)),
                  pl.BlockSpec((1, F_ent), lambda i: (0, 0)),
                  pl.BlockSpec((F_ent, HD), lambda i: (0, 0))],
        out_specs=[pl.BlockSpec((row_tile, F_ent), lambda i: (i, 0)),
                   pl.BlockSpec((row_tile, HD), lambda i: (i, 0))],
        out_shape=(jax.ShapeDtypeStruct((N, F_ent), f32),
                   jax.ShapeDtypeStruct((N, HD), f32)),
        compiler_params=cp_rows,
    )(ent_feat, params["g_gamma"], params["g_beta"], params["w_ent_t"])

    # --- kernel 2: rel_fc + relation attention scores (tiny) ---
    er = pl.pallas_call(
        rel_proj_kernel,
        grid=(1,),
        in_specs=[pl.BlockSpec((R, F_rel), lambda i: (0, 0)),
                  pl.BlockSpec((F_rel, HD), lambda i: (0, 0)),
                  pl.BlockSpec((1, HD), lambda i: (0, 0)),
                  pl.BlockSpec((H, HD), lambda i: (0, 0))],
        out_specs=pl.BlockSpec((R, H), lambda i: (0, 0)),
        out_shape=jax.ShapeDtypeStruct((R, H), f32),
        compiler_params=cp_single,
    )(rel_feat, params["w_rel_t"], params["attn_r"], selT)

    # --- kernel 3: attention + edge softmax + PPR diffusion ---
    k3 = functools.partial(attn_ppr_kernel, num_heads=H, head_dim=D,
                           hop_num=hop_num, alpha=alpha, slope=slope)
    rst = pl.pallas_call(
        k3,
        grid=(1,),
        in_specs=[pl.BlockSpec((N, HD), lambda i: (0, 0)),      # feat   (lane-dense)
                  pl.BlockSpec((N, N), lambda i: (0, 0)),       # adj
                  pl.BlockSpec((N, N), lambda i: (0, 0)),       # etype  (int32)
                  pl.BlockSpec((1, HD), lambda i: (0, 0)),      # attn_h
                  pl.BlockSpec((1, HD), lambda i: (0, 0)),      # attn_t
                  pl.BlockSpec((H, HD), lambda i: (0, 0)),      # head selector
                  pl.BlockSpec(memory_space=pltpu.MemorySpace.SMEM)],  # er [R, H] scalar table
        out_specs=pl.BlockSpec((N, HD), lambda i: (0, 0)),
        out_shape=jax.ShapeDtypeStruct((N, HD), f32),
        compiler_params=cp_single,
    )(feat, adj, etype, params["attn_h"], params["attn_t"], selT, er)

    # --- kernel 4: residual + ff LayerNorm + FFN + residual, tiled over rows ---
    out = pl.pallas_call(
        res_ffn_kernel,
        grid=(n_row_blocks,),
        in_specs=[pl.BlockSpec((row_tile, HD), lambda i: (i, 0)),
                  pl.BlockSpec((row_tile, HD), lambda i: (i, 0)),
                  pl.BlockSpec((1, HD), lambda i: (0, 0)),
                  pl.BlockSpec((1, HD), lambda i: (0, 0)),
                  pl.BlockSpec((HD, 4 * HD), lambda i: (0, 0)),
                  pl.BlockSpec((1, 4 * HD), lambda i: (0, 0)),
                  pl.BlockSpec((4 * HD, HD), lambda i: (0, 0)),
                  pl.BlockSpec((1, HD), lambda i: (0, 0))],
        out_specs=pl.BlockSpec((row_tile, HD), lambda i: (i, 0)),
        out_shape=jax.ShapeDtypeStruct((N, HD), f32),
        compiler_params=cp_rows,
    )(rst, ln, params["ff_gamma"], params["ff_beta"],
      params["w1_t"].astype(jnp.bfloat16), params["b1"],
      params["w2_t"].astype(jnp.bfloat16), params["b2"])
    return out


# ---------------------------------------------------------------------------
# Deterministic parameter init (synthetic; mirrors shapes of the torch module)
# ---------------------------------------------------------------------------
def small_init_gain(d_in, d_out):
    return 2.0 / (d_in + 4.0 * d_out)


def xavier_normal(key, shape, gain):
    fan_out, fan_in = shape[0], shape[-1]
    std = gain * (2.0 / (fan_in + fan_out)) ** 0.5
    return std * jax.random.normal(key, shape, dtype=jnp.float32)


if __name__ == "__main__":
    # Small, module-consistent shapes.
    N = 16                 # number of entity nodes
    F_ent = 32             # in_ent_feats
    F_rel = 16             # in_rel_feats
    H, D = 4, 8            # num_heads, head_dim  (out_ent_feats = 32 == in_ent_feats)
    HD = H * D
    R = 4                  # number of relation types
    hop_num = 3
    alpha = 0.15
    slope = 0.2            # LeakyReLU negative_slope

    key = jax.random.PRNGKey(0)
    ks = jax.random.split(key, 12)

    ent_feat = jax.random.normal(ks[0], (N, F_ent), dtype=jnp.float32)
    rel_feat = jax.random.normal(ks[1], (R, F_rel), dtype=jnp.float32)

    # Dense graph: adjacency A[dst, src] with guaranteed self-loops (in-degree >= 1),
    # and a deterministic edge-type matrix.
    adj = (jax.random.uniform(ks[2], (N, N)) < 0.4).astype(jnp.float32)
    adj = jnp.maximum(adj, jnp.eye(N, dtype=jnp.float32))
    etype = ((jnp.arange(N)[:, None] * 3 + jnp.arange(N)[None, :]) % R).astype(jnp.int32)

    gain = small_init_gain(F_ent, F_ent)
    gain_ffn1 = small_init_gain(HD, 4 * HD)
    gain_ffn2 = small_init_gain(4 * HD, HD)

    params = {
        # graph LayerNorm (elementwise affine)
        "g_gamma": jnp.ones((1, F_ent), jnp.float32),
        "g_beta": jnp.zeros((1, F_ent), jnp.float32),
        # ent_fc / rel_fc weights, stored pre-transposed for y = x @ W^T
        "w_ent_t": xavier_normal(ks[3], (HD, F_ent), gain).T,     # [F_ent, HD]
        "w_rel_t": xavier_normal(ks[4], (HD, F_rel), gain).T,     # [F_rel, HD]
        # attention vectors (1, H, D) flattened to (1, H*D)
        "attn_h": xavier_normal(ks[5], (1, H, D), gain).reshape(1, HD),
        "attn_t": xavier_normal(ks[6], (1, H, D), gain).reshape(1, HD),
        "attn_r": xavier_normal(ks[7], (1, H, D), gain).reshape(1, HD),
        # ff LayerNorm
        "ff_gamma": jnp.ones((1, HD), jnp.float32),
        "ff_beta": jnp.zeros((1, HD), jnp.float32),
        # PositionwiseFeedForward
        "w1_t": xavier_normal(ks[8], (4 * HD, HD), gain_ffn1).T,  # [HD, 4HD]
        "b1": jnp.zeros((1, 4 * HD), jnp.float32),
        "w2_t": xavier_normal(ks[9], (HD, 4 * HD), gain_ffn2).T,  # [4HD, HD]
        "b2": jnp.zeros((1, HD), jnp.float32),
    }

    out = rgdt_forward(params, ent_feat, rel_feat, adj, etype,
                       num_heads=H, head_dim=D, hop_num=hop_num,
                       alpha=alpha, slope=slope)
    out = jax.block_until_ready(out)

    assert out.shape == (N, HD), out.shape
    assert bool(jnp.all(jnp.isfinite(out)))
    print("KERNEL_OK")
</pallas_src>

<mosaic_0001>
module attributes {stable_mosaic.version = 11 : i64} {
  func.func @ent_proj_kernel(%arg0: i32, %arg1: memref<16x32xf32, #tpu.memory_space<vmem>>, %arg2: memref<1x32xf32, #tpu.memory_space<vmem>>, %arg3: memref<1x32xf32, #tpu.memory_space<vmem>>, %arg4: memref<32x32xf32, #tpu.memory_space<vmem>>, %arg5: memref<16x32xf32, #tpu.memory_space<vmem>>, %arg6: memref<16x32xf32, #tpu.memory_space<vmem>>) attributes {dimension_semantics = [#tpu.dimension_semantics<parallel>], iteration_bounds = array<i64: 1>, scalar_prefetch = 0 : i64, scratch_operands = 0 : i64, tpu.core_type = #tpu.core_type<tc>, window_params = [{transform_indices = @transform_0, window_bounds = array<i64: 16, 32>}, {pipeline_mode = #tpu.pipeline_mode<synchronous>, transform_indices = @transform_1, window_bounds = array<i64: 1, 32>}, {pipeline_mode = #tpu.pipeline_mode<synchronous>, transform_indices = @transform_2, window_bounds = array<i64: 1, 32>}, {pipeline_mode = #tpu.pipeline_mode<synchronous>, transform_indices = @transform_3, window_bounds = array<i64: 32, 32>}, {transform_indices = @transform_4, window_bounds = array<i64: 16, 32>}, {transform_indices = @transform_5, window_bounds = array<i64: 16, 32>}]} {
    %c0 = arith.constant 0 : index
    %c0_0 = arith.constant 0 : index
    %0 = vector.load %arg1[%c0, %c0_0] : memref<16x32xf32, #tpu.memory_space<vmem>>, vector<16x32xf32>
    %cst = arith.constant dense<0.000000e+00> : vector<16xf32>
    %1 = vector.multi_reduction <add>, %0, %cst [1] : vector<16x32xf32> to vector<16xf32>
    %2 = vector.shape_cast %1 : vector<16xf32> to vector<16x1xf32>
    %cst_1 = arith.constant 3.200000e+01 : f32
    %3 = vector.broadcast %cst_1 : f32 to vector<16x1xf32>
    %4 = arith.divf %2, %3 : vector<16x1xf32>
    %5 = vector.broadcast %4 : vector<16x1xf32> to vector<16x32xf32>
    %6 = arith.subf %0, %5 : vector<16x32xf32>
    %7 = arith.mulf %6, %6 : vector<16x32xf32>
    %cst_2 = arith.constant dense<0.000000e+00> : vector<16xf32>
    %8 = vector.multi_reduction <add>, %7, %cst_2 [1] : vector<16x32xf32> to vector<16xf32>
    %9 = vector.shape_cast %8 : vector<16xf32> to vector<16x1xf32>
    %cst_3 = arith.constant 3.200000e+01 : f32
    %10 = vector.broadcast %cst_3 : f32 to vector<16x1xf32>
    %11 = arith.divf %9, %10 : vector<16x1xf32>
    %cst_4 = arith.constant 9.99999974E-6 : f32
    %12 = vector.broadcast %cst_4 : f32 to vector<16x1xf32>
    %13 = arith.addf %11, %12 : vector<16x1xf32>
    %14 = math.rsqrt %13 : vector<16x1xf32>
    %15 = vector.broadcast %14 : vector<16x1xf32> to vector<16x32xf32>
    %16 = arith.mulf %6, %15 : vector<16x32xf32>
    %c0_5 = arith.constant 0 : index
    %c0_6 = arith.constant 0 : index
    %17 = vector.load %arg2[%c0_5, %c0_6] : memref<1x32xf32, #tpu.memory_space<vmem>>, vector<1x32xf32>
    %18 = vector.broadcast %17 : vector<1x32xf32> to vector<16x32xf32>
    %19 = arith.mulf %16, %18 : vector<16x32xf32>
    %c0_7 = arith.constant 0 : index
    %c0_8 = arith.constant 0 : index
    %20 = vector.load %arg3[%c0_7, %c0_8] : memref<1x32xf32, #tpu.memory_space<vmem>>, vector<1x32xf32>
    %21 = vector.broadcast %20 : vector<1x32xf32> to vector<16x32xf32>
    %22 = arith.addf %19, %21 : vector<16x32xf32>
    %c0_9 = arith.constant 0 : index
    %c0_10 = arith.constant 0 : index
    %23 = vector.load %arg5[%c0_9, %c0_10] : memref<16x32xf32, #tpu.memory_space<vmem>>, vector<16x32xf32>
    tpu.vector_store %arg5[%c0_9, %c0_10], %22 {strides = array<i32>} : memref<16x32xf32, #tpu.memory_space<vmem>>, vector<16x32xf32>,
    %c0_11 = arith.constant 0 : index
    %c0_12 = arith.constant 0 : index
    %24 = vector.load %arg4[%c0_11, %c0_12] : memref<32x32xf32, #tpu.memory_space<vmem>>, vector<32x32xf32>
    %cst_13 = arith.constant dense<0.000000e+00> : vector<16x32xf32>
    %25 = tpu.matmul %22, %24, %cst_13 {dimension_numbers = #tpu.dot_dimension_numbers<[1], [0], [0], [1], [0, 0, 1, 1], [], []>} : vector<16x32xf32>, vector<32x32xf32>, vector<16x32xf32> -> vector<16x32xf32>
    %c0_14 = arith.constant 0 : index
    %c0_15 = arith.constant 0 : index
    %26 = vector.load %arg6[%c0_14, %c0_15] : memref<16x32xf32, #tpu.memory_space<vmem>>, vector<16x32xf32>
    tpu.vector_store %arg6[%c0_14, %c0_15], %25 {strides = array<i32>} : memref<16x32xf32, #tpu.memory_space<vmem>>, vector<16x32xf32>,
    return
  }
  func.func @transform_0(%arg0: i32) -> (i32, i32) {
    %c0_i32 = arith.constant 0 : i32
    %c0_i32_0 = arith.constant 0 : i32
    return %arg0, %c0_i32 : i32, i32
  }
  func.func @transform_1(%arg0: i32) -> (i32, i32) {
    %c0_i32 = arith.constant 0 : i32
    %c0_i32_0 = arith.constant 0 : i32
    %c0_i32_1 = arith.constant 0 : i32
    return %c0_i32, %c0_i32_0 : i32, i32
  }
  func.func @transform_2(%arg0: i32) -> (i32, i32) {
    %c0_i32 = arith.constant 0 : i32
    %c0_i32_0 = arith.constant 0 : i32
    %c0_i32_1 = arith.constant 0 : i32
    return %c0_i32, %c0_i32_0 : i32, i32
  }
  func.func @transform_3(%arg0: i32) -> (i32, i32) {
    %c0_i32 = arith.constant 0 : i32
    %c0_i32_0 = arith.constant 0 : i32
    %c0_i32_1 = arith.constant 0 : i32
    return %c0_i32, %c0_i32_0 : i32, i32
  }
  func.func @transform_4(%arg0: i32) -> (i32, i32) {
    %c0_i32 = arith.constant 0 : i32
    %c0_i32_0 = arith.constant 0 : i32
    return %arg0, %c0_i32 : i32, i32
  }
  func.func @transform_5(%arg0: i32) -> (i32, i32) {
    %c0_i32 = arith.constant 0 : i32
    %c0_i32_0 = arith.constant 0 : i32
    return %arg0, %c0_i32 : i32, i32
  }
}

</mosaic_0001>

<bundles_post_ra>
// kernel: tpu_custom_call.1
= control target key start
LH: loop header
LB: loop body
LE: loop exit
PB: predicated region body
PF: predicated region fallthrough
CT: control target
= control target key end

     0   :  { %11 = vsyncpa [#allocation3], 0  ;;  %s467_s0 = inlined_call_operand.hbm [shape: f32[16,32], index: 0, kind: input, shape index: {}]   ;;  %s468_s1 = inlined_call_operand.vmem [shape: f32[1,32], index: 1, kind: input, shape index: {}]   ;;  %s469_s2 = inlined_call_operand.vmem [shape: f32[1,32], index: 2, kind: input, shape index: {}]   ;;  %s470_s3 = inlined_call_operand.hbm [shape: f32[32,32], index: 3, kind: input, shape index: {}]   ;;  %s471_s4 = inlined_call_operand.hbm [shape: f32[16,32], index: 4, kind: output, shape index: {0}]   ;;  %s472_s5 = inlined_call_operand.hbm [shape: f32[16,32], index: 5, kind: output, shape index: {1}]  }
   0x1   :  { %12 = vsyncpa [#allocation6], 0 }
   0x2   :  { %13 = vsyncpa [#allocation4], 0 }
   0x3   :  { %14 = vsyncpa [#allocation9], 0  ;;  %s355_s18 = smov [#allocation2]   ;;  %s259_s22 = scalar_lea.hbm %s467_s0, 256 }
   0x4   :  { %s20_s19 = sshll.u32 %s355_s18, 4  ;;  %p260_p0 = scmp.ne.s32.totalorder %s467_s0, %s259_s22  ;;  %s21_s19 = int_to_ptr.vmem [resolvable:$true] %s20_s19 }
   0x5   :  { %p263_p1 = scmp.lt.u32.totalorder %s259_s22, %s467_s0 }
   0x7   :  { %p265_p2 = pnand %p263_p1, %p260_p0 }
   0x9   :  { %268 = shalt.err (!%p265_p2)
}
   0xa   :  { %s269_s27 = scalar_lea.vmem %s21_s19, 256  ;;  %p274_p4 = scmp.lt.s32.totalorder %s21_s19, %s21_s19 }
   0xb   :  { %p270_p3 = scmp.ne.s32.totalorder %s21_s19, %s269_s27  ;;  %p275_p5 = scmp.lt.s32.totalorder %s269_s27, %s269_s27 }
   0xd   :  { %p276_p6 = por %p275_p5, %p274_p4 }
   0xf   :  { %p277_p7 = pnand %p276_p6, %p270_p3 }
  0x11   :  { %280 = shalt.err (!%p277_p7)
}
  0x12   :  { %s356_s28 = smov 128   ;;  %s357_s29 = smov 8  }
  0x13   :  { %26 = dma.hbm_to_vmem [thread:$0]  %s467_s0, 256, %s21_s19, [#allocation3], %s356_s28, %s356_s28, %s357_s29  }
  0x14   :  { %s358_s7 = smov [#allocation5]   ;;  %s281_s11 = scalar_lea.hbm %s470_s3, 512 }
  0x15   :  { %s36_s8 = sshll.u32 %s358_s7, 4  ;;  %p282_p8 = scmp.ne.s32.totalorder %s470_s3, %s281_s11  ;;  %s37_s8 = int_to_ptr.vmem [resolvable:$true] %s36_s8 }
  0x16   :  { %p285_p9 = scmp.lt.u32.totalorder %s281_s11, %s470_s3 }
  0x18   :  { %p287_p10 = pnand %p285_p9, %p282_p8 }
  0x1a   :  { %290 = shalt.err (!%p287_p10)
}
  0x1b   :  { %s291_s16 = scalar_lea.vmem %s37_s8, 512  ;;  %p296_p12 = scmp.lt.s32.totalorder %s37_s8, %s37_s8 }
  0x1c   :  { %p292_p11 = scmp.ne.s32.totalorder %s37_s8, %s291_s16  ;;  %p297_p13 = scmp.lt.s32.totalorder %s291_s16, %s291_s16 }
  0x1e   :  { %p298_p0 = por %p297_p13, %p296_p12 }
  0x20   :  { %p299_p1 = pnand %p298_p0, %p292_p11 }
  0x22   :  { %302 = shalt.err (!%p299_p1)
}
  0x23   :  { %42 = dma.hbm_to_vmem [thread:$0]  %s470_s3, 512, %s37_s8, [#allocation6], %s356_s28, %s356_s28, %s357_s29  }
  0x24   :  { %347 = dma.done.wait [#allocation3], 256  }
  0x25   :  { %348 = vsyncadd [#allocation3], 4294967040 }
  0x26   :  { %349 = dma.done.wait [#allocation6], 512  }
  0x27   :  { %350 = vsyncadd [#allocation6], 4294966784  ;;  %vm51_vm0 = vcmask 261120   ;;  %v49_v0 = vld [vmem:[#allocation2] sm:$0xff]  ;;  %v50_v1 = vld [vmem:[#allocation2 + $0x8] sm:$0xff] }
  0x28   :  { %v52_v2 = vsel %vm51_vm0, %v49_v0, 0.0  ;;  %v55_v3 = vsel %vm51_vm0, %v50_v1, 0.0  ;;  %v99_v14 = vld [vmem:[#allocation5] sm:$0xff]  ;;  %v100_v15 = vld [vmem:[#allocation5 + $0x8] sm:$0xff]  ;;  %v101_v16 = vld [vmem:[#allocation5 + $0x10] sm:$0xff] }
  0x29   :  { %53 = vadd.xlane.f32.xlu0 %v52_v2  ;;  %v241_v17 = vpack.c.bf16 %v100_v15, %v99_v14  ;;  %v102_v18 = vld [vmem:[#allocation5 + $0x18] sm:$0xff]  ;;  %v220_v27 = vld [vmem:[%s468_s1] ss:$0 sm:$0xff]  ;;  %s359_s1 = smov [#allocation7]  }
  0x2a   :  { %v245_v19 = vpack.c.bf16 %v102_v18, %v101_v16  ;;  %v221_v29 = vld [vmem:[%s469_s2] ss:$0 sm:$0xff]  ;;  %s191_s21 = sshll.u32 %s359_s1, 4  ;;  %s192_s21 = int_to_ptr.vmem [resolvable:$true] %s191_s21 }
  0x2b   :  { %242 = vmatprep.subr.bf16.mxu0 %v241_v17  ;;  %s303_s22 = scalar_lea.vmem %s192_s21, 256  ;;  %p308_p3 = scmp.lt.s32.totalorder %s192_s21, %s192_s21 }
  0x2c   :  { %244 = vmatpush3.bf16.msra.mxu0 %v241_v17  ;;  %p304_p2 = scmp.ne.s32.totalorder %s192_s21, %s303_s22  ;;  %p309_p4 = scmp.lt.s32.totalorder %s303_s22, %s303_s22 }
  0x2d   :  { %56 = vadd.xlane.f32.xlu0 %v55_v3  ;;  %246 = vmatprep.subr.bf16.mxu0 %v245_v19 }
  0x2e   :  { %p310_p5 = por %p309_p4, %p308_p3 }
  0x30   :  { %248 = vmatpush3.bf16.msra.mxu0 %v245_v19  ;;  %p311_p6 = pnand %p310_p5, %p304_p2 }
  0xb6   :  { %v54_v4 = vpop.xlane.xlu0 %53 }
  0xb7   :  { %v59_v5 = vmul.f32 0.03125, %v54_v4 }
  0xb9   :  { %v61_v6 = vsub.f32 %v49_v0, %v59_v5 }
  0xba   :  { %v57_v7 = vpop.xlane.xlu0 %56 }
  0xbb   :  { %v60_v8 = vmul.f32 0.03125, %v57_v7  ;;  %v63_v9 = vmul.f32 %v61_v6, %v61_v6 }
  0xbd   :  { %v62_v10 = vsub.f32 %v50_v1, %v60_v8  ;;  %v65_v11 = vsel %vm51_vm0, %v63_v9, 0.0 }
  0xbe   :  { %66 = vadd.xlane.f32.xlu1 %v65_v11 }
  0xbf   :  { %v64_v12 = vmul.f32 %v62_v10, %v62_v10 }
  0xc1   :  { %v68_v13 = vsel %vm51_vm0, %v64_v12, 0.0 }
  0xc2   :  { %69 = vadd.xlane.f32.xlu1 %v68_v13 }
 0x14b   :  { %v67_v20 = vpop.xlane.xlu1 %66 }
 0x14c   :  { %v71_v21 = vmul.f32 0.03125, %v67_v20 }
 0x14e   :  { %v73_v22 = vadd.f32 1e-05, %v71_v21 }
 0x14f   :  { %v70_v23 = vpop.xlane.xlu1 %69 }
 0x150   :  { %255 = vrsqrt.f32 %v73_v22  ;;  %v72_v24 = vmul.f32 0.03125, %v70_v23 }
 0x152   :  { %v74_v25 = vadd.f32 1e-05, %v72_v24 }
 0x154   :  { %257 = vrsqrt.f32 %v74_v25 }
 0x15a   :  { %v256_v26 = vpop.eup %255 }
 0x15b   :  { %v77_v28 = vmul.f32 %v256_v26, %v61_v6 }
 0x15d   :  { %v86_v30 = vmul.f32 %v220_v27, %v77_v28 }
 0x15e   :  { %v258_v31 = vpop.eup %257 }
 0x15f   :  { %v78_v32 = vmul.f32 %v258_v31, %v62_v10  ;;  %v95_v33 = vadd.f32 %v221_v29, %v86_v30 }
 0x161   :  { %v87_v34 = vmul.f32 %v220_v27, %v78_v32  ;;  %238 = vmatprep.mubr.msk.f32.mxu0 %vm51_vm0, %v95_v33  ;;  %97 = vst.msk [vmem:[#allocation7] sm:$0xff] %vm51_vm0, %v95_v33 }
 0x163   :  { %v96_v35 = vadd.f32 %v221_v29, %v87_v34 }
 0x165   :  { %98 = vst.msk [vmem:[#allocation7 + $0x8] sm:$0xff] %vm51_vm0, %v96_v35  ;;  %239 = vmatmul.mubr.msk.f32.vlgmr.msra.gmra.mrb[0].mxu0 %vm51_vm0, %v96_v35 }
 0x166   :  { %314 = shalt.err (!%p311_p6)
}
 0x167   :  { %s315_s24 = scalar_lea.hbm %s471_s4, 256 }
 0x168   :  { %p316_p7 = scmp.ne.s32.totalorder %s471_s4, %s315_s24  ;;  %p319_p8 = scmp.lt.u32.totalorder %s315_s24, %s471_s4 }
 0x16a   :  { %p321_p9 = pnand %p319_p8, %p316_p7 }
 0x16c   :  { %324 = shalt.err (!%p321_p9)
}
 0x16d   :  { %197 = dma.vmem_to_hbm [thread:$0]  %s192_s21, 256, %s471_s4, [#allocation4], %s356_s28, %s356_s28, %s357_s29  }
 0x16e   :  { %s360_s8 = smov [#allocation8]  }
 0x16f   :  { %s203_s9 = sshll.u32 %s360_s8, 4  ;;  %s204_s9 = int_to_ptr.vmem [resolvable:$true] %s203_s9 }
 0x170   :  { %s325_s10 = scalar_lea.vmem %s204_s9, 256  ;;  %p330_p11 = scmp.lt.s32.totalorder %s204_s9, %s204_s9 }
 0x171   :  { %p326_p10 = scmp.ne.s32.totalorder %s204_s9, %s325_s10  ;;  %p331_p12 = scmp.lt.s32.totalorder %s325_s10, %s325_s10 }
 0x173   :  { %p332_p13 = por %p331_p12, %p330_p11 }
 0x175   :  { %p333_p0 = pnand %p332_p13, %p326_p10 }
 0x238   :  { %v240_v36 = vpop.f32.mrb[0].mxu0 }
 0x239   :  { %185 = vst.msk [vmem:[#allocation8 + $0x8] sm:$0xff] %vm51_vm0, %v240_v36  ;;  %v175_v37 = vpop.f32.mrb[1].mxu0 }
 0x23a   :  { %184 = vst.msk [vmem:[#allocation8] sm:$0xff] %vm51_vm0, %v175_v37 }
 0x23b   :  { %336 = shalt.err (!%p333_p0)
}
 0x23c   :  { %s337_s4 = scalar_lea.hbm %s472_s5, 256 }
 0x23d   :  { %p338_p1 = scmp.ne.s32.totalorder %s472_s5, %s337_s4  ;;  %p341_p2 = scmp.lt.u32.totalorder %s337_s4, %s472_s5 }
 0x23f   :  { %p343_p3 = pnand %p341_p2, %p338_p1 }
 0x241   :  { %346 = shalt.err (!%p343_p3)
}
 0x242   :  { %209 = dma.vmem_to_hbm [thread:$0]  %s204_s9, 256, %s472_s5, [#allocation9], %s356_s28, %s356_s28, %s357_s29  }
 0x243   :  { %351 = dma.done.wait [#allocation4], 256  }
 0x244   :  { %352 = vsyncadd [#allocation4], 4294967040 }
 0x245   :  { %353 = dma.done.wait [#allocation9], 256  }
 0x246   :  { %354 = vsyncadd [#allocation9], 4294967040 }
 0x247   :  { %216 = vsyncpa [#allocation3], 1 }
 0x248   :  { %217 = vsyncpa [#allocation6], 1 }
 0x249   :  { %218 = vsyncpa [#allocation4], 1 }
 0x24a   :  { %219 = vsyncpa [#allocation9], 1 }

</bundles_post_ra>
